<compile_context>
chip_gen: v5e
topology: v5e:2x2
jax: 0.10.0
libtpu: 0.0.40
codegen_flags: <defaults>
</compile_context>

<pallas_src>
import functools
import math

import jax
import jax.numpy as jnp
from jax.experimental import pallas as pl
from jax.experimental.pallas import tpu as pltpu


LANE_TILE = 2048  # points per grid step; (out_dim, 2048) f32 blocks stay far below VMEM limits


def _get_num_frequencies_nyquist(samples):
    nyquist_rate = 1 / (2 * (2 * 1 / samples))
    return int(math.floor(math.log(nyquist_rate, 2)))


def _num_frequencies(in_features, sidelength=None, fn_samples=None, use_nyquist=True):
    if in_features == 3:
        return 8
    if in_features == 2:
        assert sidelength is not None
        if isinstance(sidelength, int):
            sidelength = (sidelength, sidelength)
        nf = 4
        if use_nyquist:
            nf = _get_num_frequencies_nyquist(min(sidelength[0], sidelength[1]))
        return nf
    if in_features == 1:
        assert fn_samples is not None
        nf = 4
        if use_nyquist:
            nf = _get_num_frequencies_nyquist(fn_samples)
        return nf
    if in_features == 92:
        return 4
    raise ValueError(f"Unsupported in_features={in_features}")


def _posenc_kernel(x_ref, o_ref, *, num_frequencies):
    """x_ref: (in_features, TILE)  o_ref: (out_dim, TILE), both feature-major / lane-dense."""
    x = x_ref[...]                      # (in_features, TILE) float32
    in_features = x.shape[0]

    # Identity part of the encoding.
    o_ref[0:in_features, :] = x

    row = in_features
    for i in range(num_frequencies):    # static Python unroll (num_frequencies is compile-time)
        ang = (float(2 ** i) * math.pi) * x     # (in_features, TILE)
        s = jnp.sin(ang)
        c = jnp.cos(ang)
        for j in range(in_features):
            o_ref[row:row + 1, :] = s[j:j + 1, :]
            o_ref[row + 1:row + 2, :] = c[j:j + 1, :]
            row += 2


def pos_encoding_nerf_forward(coords, in_features, sidelength=None,
                              fn_samples=None, use_nyquist=True):
    """JAX/Pallas equivalent of PosEncodingNeRF.forward.

    coords: (B, ..., in_features) float32
    returns: (B, N, out_dim) where N = prod(coords.shape[1:-1]) and
             out_dim = in_features + 2*in_features*num_frequencies
    """
    num_frequencies = _num_frequencies(in_features, sidelength, fn_samples, use_nyquist)
    out_dim = in_features + 2 * in_features * num_frequencies

    B = coords.shape[0]
    coords3 = coords.reshape(B, -1, in_features)
    N = coords3.shape[1]
    total = B * N

    # Feature-major, lane-dense layout: (in_features, B*N).
    x = coords3.reshape(total, in_features).T.astype(jnp.float32)

    # Tile the point axis (lanes); pad to a multiple of the tile width.
    if total >= LANE_TILE:
        tile = LANE_TILE
    else:
        tile = ((total + 127) // 128) * 128
    padded = ((total + tile - 1) // tile) * tile
    if padded != total:
        x = jnp.pad(x, ((0, 0), (0, padded - total)))

    grid = (padded // tile,)

    out = pl.pallas_call(
        functools.partial(_posenc_kernel, num_frequencies=num_frequencies),
        out_shape=jax.ShapeDtypeStruct((out_dim, padded), jnp.float32),
        grid=grid,
        in_specs=[pl.BlockSpec((in_features, tile), lambda i: (0, i))],
        out_specs=pl.BlockSpec((out_dim, tile), lambda i: (0, i)),
        compiler_params=pltpu.CompilerParams(
            dimension_semantics=("parallel",),
        ),
    )(x)

    out = out[:, :total]                         # strip lane padding
    out = out.T.reshape(B, N, out_dim)           # back to (B, N, out_dim)
    return out.astype(coords.dtype)


if __name__ == "__main__":
    key = jax.random.PRNGKey(0)

    B, side_len, in_features = 2, 16, 2
    N = side_len * side_len                      # 256 points (a 16x16 uv grid)
    coords = jax.random.uniform(
        key, (B, N, in_features), dtype=jnp.float32, minval=-1.0, maxval=1.0
    )

    out = pos_encoding_nerf_forward(coords, in_features, sidelength=(side_len, side_len))
    out = jax.block_until_ready(out)

    # Pure-JAX reference (mirrors the PyTorch loop order exactly).
    num_frequencies = _num_frequencies(in_features, sidelength=(side_len, side_len))
    out_dim = in_features + 2 * in_features * num_frequencies
    ref_pieces = [coords]
    for i in range(num_frequencies):
        for j in range(in_features):
            c = coords[..., j]
            ref_pieces.append(jnp.sin((2.0 ** i) * math.pi * c)[..., None])
            ref_pieces.append(jnp.cos((2.0 ** i) * math.pi * c)[..., None])
    ref = jnp.concatenate(ref_pieces, axis=-1)

    assert out.shape == (B, N, out_dim)
    assert jnp.allclose(out, ref, atol=1e-5, rtol=1e-5)

    print("KERNEL_OK")
</pallas_src>

<mosaic_0001>
module attributes {stable_mosaic.version = 11 : i64} {
  func.func @_posenc_kernel(%arg0: i32, %arg1: memref<2x512xf32, #tpu.memory_space<vmem>>, %arg2: memref<10x512xf32, #tpu.memory_space<vmem>>) attributes {dimension_semantics = [#tpu.dimension_semantics<parallel>], iteration_bounds = array<i64: 1>, scalar_prefetch = 0 : i64, scratch_operands = 0 : i64, tpu.core_type = #tpu.core_type<tc>, window_params = [{transform_indices = @transform_0, window_bounds = array<i64: 2, 512>}, {transform_indices = @transform_1, window_bounds = array<i64: 10, 512>}]} {
    %c0 = arith.constant 0 : index
    %c0_0 = arith.constant 0 : index
    %0 = vector.load %arg1[%c0, %c0_0] : memref<2x512xf32, #tpu.memory_space<vmem>>, vector<2x512xf32>
    %c0_1 = arith.constant 0 : index
    %c0_2 = arith.constant 0 : index
    %1 = vector.load %arg2[%c0_1, %c0_2] : memref<10x512xf32, #tpu.memory_space<vmem>>, vector<2x512xf32>
    tpu.vector_store %arg2[%c0_1, %c0_2], %0 {strides = array<i32>} : memref<10x512xf32, #tpu.memory_space<vmem>>, vector<2x512xf32>,
    %cst = arith.constant 3.14159274 : f32
    %2 = vector.broadcast %cst : f32 to vector<2x512xf32>
    %3 = arith.mulf %2, %0 : vector<2x512xf32>
    %4 = math.sin %3 : vector<2x512xf32>
    %5 = math.cos %3 : vector<2x512xf32>
    %6 = vector.extract_strided_slice %4 {offsets = [0, 0], sizes = [1, 512], strides = [1, 1]} : vector<2x512xf32> to vector<1x512xf32>
    %c2 = arith.constant 2 : index
    %c0_3 = arith.constant 0 : index
    %7 = vector.load %arg2[%c2, %c0_3] : memref<10x512xf32, #tpu.memory_space<vmem>>, vector<1x512xf32>
    tpu.vector_store %arg2[%c2, %c0_3], %6 {strides = array<i32>} : memref<10x512xf32, #tpu.memory_space<vmem>>, vector<1x512xf32>,
    %8 = vector.extract_strided_slice %5 {offsets = [0, 0], sizes = [1, 512], strides = [1, 1]} : vector<2x512xf32> to vector<1x512xf32>
    %c3 = arith.constant 3 : index
    %c0_4 = arith.constant 0 : index
    %9 = vector.load %arg2[%c3, %c0_4] : memref<10x512xf32, #tpu.memory_space<vmem>>, vector<1x512xf32>
    tpu.vector_store %arg2[%c3, %c0_4], %8 {strides = array<i32>} : memref<10x512xf32, #tpu.memory_space<vmem>>, vector<1x512xf32>,
    %10 = vector.extract_strided_slice %4 {offsets = [1, 0], sizes = [1, 512], strides = [1, 1]} : vector<2x512xf32> to vector<1x512xf32>
    %c4 = arith.constant 4 : index
    %c0_5 = arith.constant 0 : index
    %11 = vector.load %arg2[%c4, %c0_5] : memref<10x512xf32, #tpu.memory_space<vmem>>, vector<1x512xf32>
    tpu.vector_store %arg2[%c4, %c0_5], %10 {strides = array<i32>} : memref<10x512xf32, #tpu.memory_space<vmem>>, vector<1x512xf32>,
    %12 = vector.extract_strided_slice %5 {offsets = [1, 0], sizes = [1, 512], strides = [1, 1]} : vector<2x512xf32> to vector<1x512xf32>
    %c5 = arith.constant 5 : index
    %c0_6 = arith.constant 0 : index
    %13 = vector.load %arg2[%c5, %c0_6] : memref<10x512xf32, #tpu.memory_space<vmem>>, vector<1x512xf32>
    tpu.vector_store %arg2[%c5, %c0_6], %12 {strides = array<i32>} : memref<10x512xf32, #tpu.memory_space<vmem>>, vector<1x512xf32>,
    %cst_7 = arith.constant 6.28318548 : f32
    %14 = vector.broadcast %cst_7 : f32 to vector<2x512xf32>
    %15 = arith.mulf %14, %0 : vector<2x512xf32>
    %16 = math.sin %15 : vector<2x512xf32>
    %17 = math.cos %15 : vector<2x512xf32>
    %18 = vector.extract_strided_slice %16 {offsets = [0, 0], sizes = [1, 512], strides = [1, 1]} : vector<2x512xf32> to vector<1x512xf32>
    %c6 = arith.constant 6 : index
    %c0_8 = arith.constant 0 : index
    %19 = vector.load %arg2[%c6, %c0_8] : memref<10x512xf32, #tpu.memory_space<vmem>>, vector<1x512xf32>
    tpu.vector_store %arg2[%c6, %c0_8], %18 {strides = array<i32>} : memref<10x512xf32, #tpu.memory_space<vmem>>, vector<1x512xf32>,
    %20 = vector.extract_strided_slice %17 {offsets = [0, 0], sizes = [1, 512], strides = [1, 1]} : vector<2x512xf32> to vector<1x512xf32>
    %c7 = arith.constant 7 : index
    %c0_9 = arith.constant 0 : index
    %21 = vector.load %arg2[%c7, %c0_9] : memref<10x512xf32, #tpu.memory_space<vmem>>, vector<1x512xf32>
    tpu.vector_store %arg2[%c7, %c0_9], %20 {strides = array<i32>} : memref<10x512xf32, #tpu.memory_space<vmem>>, vector<1x512xf32>,
    %22 = vector.extract_strided_slice %16 {offsets = [1, 0], sizes = [1, 512], strides = [1, 1]} : vector<2x512xf32> to vector<1x512xf32>
    %c8 = arith.constant 8 : index
    %c0_10 = arith.constant 0 : index
    %23 = vector.load %arg2[%c8, %c0_10] : memref<10x512xf32, #tpu.memory_space<vmem>>, vector<1x512xf32>
    tpu.vector_store %arg2[%c8, %c0_10], %22 {strides = array<i32>} : memref<10x512xf32, #tpu.memory_space<vmem>>, vector<1x512xf32>,
    %24 = vector.extract_strided_slice %17 {offsets = [1, 0], sizes = [1, 512], strides = [1, 1]} : vector<2x512xf32> to vector<1x512xf32>
    %c9 = arith.constant 9 : index
    %c0_11 = arith.constant 0 : index
    %25 = vector.load %arg2[%c9, %c0_11] : memref<10x512xf32, #tpu.memory_space<vmem>>, vector<1x512xf32>
    tpu.vector_store %arg2[%c9, %c0_11], %24 {strides = array<i32>} : memref<10x512xf32, #tpu.memory_space<vmem>>, vector<1x512xf32>,
    return
  }
  func.func @transform_0(%arg0: i32) -> (i32, i32) {
    %c0_i32 = arith.constant 0 : i32
    %c0_i32_0 = arith.constant 0 : i32
    return %c0_i32, %arg0 : i32, i32
  }
  func.func @transform_1(%arg0: i32) -> (i32, i32) {
    %c0_i32 = arith.constant 0 : i32
    %c0_i32_0 = arith.constant 0 : i32
    return %c0_i32, %arg0 : i32, i32
  }
}

</mosaic_0001>

<bundles_post_ra>
// kernel: tpu_custom_call.1
= control target key start
LH: loop header
LB: loop body
LE: loop exit
PB: predicated region body
PF: predicated region fallthrough
CT: control target
= control target key end

     0   :  { %6 = vsyncpa [#allocation3], 0  ;;  %s1063_s0 = inlined_call_operand.hbm [shape: f32[2,512], index: 0, kind: input, shape index: {}]   ;;  %s1064_s1 = inlined_call_operand.hbm [shape: f32[10,512], index: 1, kind: output, shape index: {}]  }
   0x1   :  { %7 = vsyncpa [#allocation4], 0  ;;  %s13_s8 = sshll.u32 %s1063_s0, 4  ;;  %s831_s9 = smov [#allocation2]   ;;  %s14_s8 = int_to_ptr.hbm [resolvable:$true] %s13_s8 }
   0x2   :  { %s15_s10 = sshll.u32 %s831_s9, 4  ;;  %s16_s10 = int_to_ptr.vmem [resolvable:$true] %s15_s10 }
   0x3   :  { %18 = dma.hbm_to_vmem [thread:$0]  %s14_s8, 128, %s16_s10, [#allocation3]  }
   0x4   :  { %827 = dma.done.wait [#allocation3], 128  }
   0x5   :  { %828 = vsyncadd [#allocation3], 4294967168  ;;  %v23_v0 = vld [vmem:[#allocation2] sm:$0xff]  ;;  %v832_v22 = vmov 683565275   ;;  %s839_s0 = smov [#allocation5]  }
   0x6   :  { %25 = vst [vmem:[#allocation1] ss:$4 sm:$0xff] %v23_v0  ;;  %v855_v1 = vmul.f32 3.1415927, %v23_v0  ;;  %v857_v2 = vmul.f32 6.2831855, %v23_v0 }
   0x7   :  { %v833_v24 = vmov 2475754826   ;;  %v834_v26 = vmov 2131351028   ;;  %v835_v29 = vmov 2102212464  }
   0x8   :  { %v42_v3 = vand.u32 2139095040, %v855_v1  ;;  %v395_v4 = vand.u32 2139095040, %v857_v2  ;;  %v39_v6 = vand.u32 2147483647, %v855_v1  ;;  %v392_v9 = vand.u32 2147483647, %v857_v2 }
   0x9   :  { %v836_v31 = vmov 920167782   ;;  %v837_v41 = vmov 1326507024   ;;  %s741_s11 = sshll.u32 %s839_s0, 4  ;;  %s743_s14 = sshll.u32 %s1064_s1, 4  ;;  %s742_s11 = int_to_ptr.vmem [resolvable:$true] %s741_s11  ;;  %s744_s14 = int_to_ptr.hbm [resolvable:$true] %s743_s14 }
   0xa   :  { %v43_v5 = vshrl.u32 %v42_v3, 23  ;;  %v396_v7 = vshrl.u32 %v395_v4, 23  ;;  %v46_v12 = vand.u32 8388607, %v39_v6  ;;  %v399_v15 = vand.u32 8388607, %v392_v9 }
   0xb   :  { %s840_s15 = smov 512   ;;  %s841_s16 = smov 32  }
   0xc   :  { %v756_v8 = vadd.s32 4294967169, %v43_v5  ;;  %v762_v10 = vadd.s32 4294967169, %v396_v7  ;;  %v47_v19 = vor.u32 8388608, %v46_v12  ;;  %v400_v33 = vor.u32 8388608, %v399_v15 }
   0xd   :  { %v26_v18 = vld.sshfl [vmem:[#allocation1] sm:$0xff pattern:$0x73625140]  ;;  %v27_v28 = vld.sshfl [vmem:[#allocation1 + $0x8] sm:$0xff pattern:$0x73625140] }
   0xe   :  { %v49_v11 = vadd.s32 1, %v756_v8  ;;  %v402_v13 = vadd.s32 1, %v762_v10  ;;  %34 = vst [vmem:[#allocation5] sm:$0x3] %v26_v18  ;;  %v871_v43 = vshll.u32 %v47_v19, 8  ;;  %v880_v51 = vshll.u32 %v400_v33, 8 }
   0xf   :  { %35 = vst [vmem:[#allocation5 + $0x8] sm:$0x3] %v27_v28  ;;  %v28_v38 = vld.sshfl [vmem:[#allocation1 + $0x10] sm:$0xff pattern:$0x73625140] }
  0x10   :  { %vm50_vm0 = vcmp.gt.s32.totalorder %v49_v11, 0  ;;  %vm403_vm1 = vcmp.gt.s32.totalorder %v402_v13, 0  ;;  %v29_v39 = vld.sshfl [vmem:[#allocation1 + $0x18] sm:$0xff pattern:$0x73625140]  ;;  %v88_v55 = vand.u32 65535, %v871_v43 }
  0x11   :  { %v51_v14 = vsel %vm50_vm0, %v49_v11, 0  ;;  %v404_v17 = vsel %vm403_vm1, %v402_v13, 0  ;;  %36 = vst [vmem:[#allocation5 + $0x10] sm:$0x3] %v28_v38  ;;  %v89_v3 = vshrl.u32 %v871_v43, 16  ;;  %v441_v11 = vand.u32 65535, %v880_v51 }
  0x12   :  { %v53_v16 = vand.u32 31, %v51_v14  ;;  %v867_v20 = vshrl.u32 %v51_v14, 5  ;;  %v406_v34 = vand.u32 31, %v404_v17  ;;  %37 = vst [vmem:[#allocation5 + $0x18] sm:$0x3] %v29_v39  ;;  %v902_v7 = vshrl.u32 %v404_v17, 5 }
  0x13   :  { %v913_v15 = vshrl.u32 %v880_v51, 16 }
  0x14   :  { %v54_v21 = vsub.s32 32, %v53_v16  ;;  %v56_v23 = vshll.u32 %v832_v22, %v53_v16  ;;  %v59_v25 = vshll.u32 %v833_v24, %v53_v16  ;;  %v62_v27 = vshll.u32 %v834_v26, %v53_v16 }
  0x15   :  { %v65_v30 = vshll.u32 %v835_v29, %v53_v16  ;;  %v68_v32 = vshll.u32 %v836_v31, %v53_v16  ;;  %vm71_vm2 = vcmp.lt.s32.totalorder %v867_v20, 1  ;;  %vm74_vm3 = vcmp.lt.s32.totalorder %v867_v20, 4 }
  0x16   :  { %v57_v35 = vshrl.u32 %v833_v24, %v54_v21  ;;  %v60_v36 = vshrl.u32 %v834_v26, %v54_v21  ;;  %v63_v37 = vshrl.u32 %v835_v29, %v54_v21  ;;  %v66_v40 = vshrl.u32 %v836_v31, %v54_v21 }
  0x17   :  { %v69_v42 = vshrl.u32 %v837_v41, %v54_v21  ;;  %vm73_vm4 = vcmp.lt.s32.totalorder %v867_v20, 3  ;;  %v875_v49 = vsub.s32 32, %v406_v34  ;;  %vm72_vm5 = vcmp.lt.s32.totalorder %v867_v20, 2 }
  0x18   :  { %v58_v44 = vor.u32 %v57_v35, %v56_v23  ;;  %v61_v45 = vor.u32 %v60_v36, %v59_v25  ;;  %v64_v46 = vor.u32 %v63_v37, %v62_v27  ;;  %v67_v47 = vor.u32 %v66_v40, %v65_v30 }
  0x19   :  { %v70_v48 = vor.u32 %v69_v42, %v68_v32  ;;  %v55_v56 = vshrl.u32 %v832_v22, %v54_v21  ;;  %v409_v59 = vshll.u32 %v832_v22, %v406_v34  ;;  %v410_v61 = vshrl.u32 %v833_v24, %v875_v49 }
  0x1a   :  { %v83_v50 = vsel %vm71_vm2, %v61_v45, %v64_v46  ;;  %v79_v52 = vsel %vm71_vm2, %v58_v44, %v61_v45  ;;  %v80_v53 = vsel %vm74_vm3, %v67_v47, 920167782  ;;  %v412_v62 = vshll.u32 %v833_v24, %v406_v34 }
  0x1b   :  { %v84_v54 = vsel %vm74_vm3, %v70_v48, 1326507024  ;;  %v81_v57 = vsel %vm73_vm4, %v64_v46, %v80_v53  ;;  %v413_v63 = vshrl.u32 %v834_v26, %v875_v49  ;;  %v415_v8 = vshll.u32 %v834_v26, %v406_v34 }
  0x1c   :  { %v85_v58 = vsel %vm73_vm4, %v67_v47, %v84_v54  ;;  %v82_v0 = vsel %vm72_vm5, %v79_v52, %v81_v57  ;;  %v416_v10 = vshrl.u32 %v835_v29, %v875_v49  ;;  %v908_v12 = vsel %vm71_vm2, %v55_v56, %v58_v44 }
  0x1d   :  { %v86_v60 = vsel %vm72_vm5, %v83_v50, %v85_v58  ;;  %v76_v16 = vsel %vm74_vm3, %v64_v46, 2102212464  ;;  %v113_v17 = vshrl.u32 %v82_v0, 16  ;;  %v917_v18 = vor.u32 %v410_v61, %v409_v59 }
  0x1e   :  { %v90_v4 = vand.u32 65535, %v86_v60  ;;  %v91_v5 = vshrl.u32 %v86_v60, 16  ;;  %v919_v19 = vor.u32 %v413_v63, %v412_v62  ;;  %v924_v24 = vor.u32 %v416_v10, %v415_v8 }
  0x1f   :  { %v418_v25 = vshll.u32 %v835_v29, %v406_v34  ;;  %v419_v26 = vshrl.u32 %v836_v31, %v875_v49  ;;  %v421_v27 = vshll.u32 %v836_v31, %v406_v34  ;;  %v422_v28 = vshrl.u32 %v837_v41, %v875_v49 }
  0x20   :  { %v92_v13 = vmul.u32 %v90_v4, %v88_v55  ;;  %v910_v14 = vmul.u32 %v91_v5, %v88_v55  ;;  %v921_v21 = vmul.u32 %v90_v4, %v89_v3  ;;  %vm424_vm6 = vcmp.lt.s32.totalorder %v902_v7, 1 }
  0x21   :  { %v931_v30 = vsel %vm73_vm4, %v61_v45, %v76_v16  ;;  %v95_v32 = vmul.u32 %v91_v5, %v89_v3  ;;  %v112_v33 = vand.u32 65535, %v82_v0  ;;  %v420_v35 = vor.u32 %v419_v26, %v418_v25 }
  0x22   :  { %v96_v23 = vshll.u32 %v910_v14, 16  ;;  %v423_v36 = vor.u32 %v422_v28, %v421_v27  ;;  %vm426_vm8 = vcmp.lt.s32.totalorder %v902_v7, 3  ;;  %vm427_vm9 = vcmp.lt.s32.totalorder %v902_v7, 4 }
  0x23   :  { %v98_v29 = vshll.u32 %v921_v21, 16  ;;  %v936_v31 = vmul.u32 %v113_v17, %v88_v55  ;;  %vm425_vm10 = vcmp.lt.s32.totalorder %v902_v7, 2  ;;  %v432_v34 = vsel %vm424_vm6, %v917_v18, %v919_v19 }
  0x24   :  { %vm100_vm7 = vc.u32 %v92_v13, %v96_v23  ;;  %v102_v37 = vadd.s32 %v96_v23, %v92_v13  ;;  %v433_v38 = vsel %vm427_vm9, %v420_v35, 920167782  ;;  %v436_v39 = vsel %vm424_vm6, %v919_v19, %v924_v24 }
  0x25   :  { %v437_v40 = vsel %vm427_vm9, %v423_v36, 1326507024  ;;  %v838_v41 = vmov 0   ;;  %v114_v44 = vmul.u32 %v112_v33, %v88_v55  ;;  %v434_v45 = vsel %vm426_vm8, %v924_v24, %v433_v38 }
  0x26   :  { %v101_v42 = vsel %vm100_vm7, 1, %v838_v41  ;;  %v438_v46 = vsel %vm426_vm8, %v420_v35, %v437_v40  ;;  %v116_v47 = vmul.u32 %v112_v33, %v89_v3  ;;  %v117_v48 = vmul.u32 %v113_v17, %v89_v3 }
  0x27   :  { %v435_v50 = vsel %vm425_vm10, %v432_v34, %v434_v45  ;;  %v439_v52 = vsel %vm425_vm10, %v436_v39, %v438_v46  ;;  %v103_v55 = vadd.s32 %v101_v42, %v95_v32  ;;  %v97_v58 = vshrl.u32 %v910_v14, 16 }
  0x28   :  { %v443_v53 = vand.u32 65535, %v439_v52  ;;  %v444_v54 = vshrl.u32 %v439_v52, 16  ;;  %v465_v56 = vand.u32 65535, %v435_v50  ;;  %v466_v57 = vshrl.u32 %v435_v50, 16 }
  0x29   :  { %vm104_vm11 = vc.u32 %v102_v37, %v98_v29  ;;  %v118_v59 = vshll.u32 %v936_v31, 16  ;;  %v99_v63 = vshrl.u32 %v921_v21, 16  ;;  %v119_v4 = vshrl.u32 %v936_v31, 16 }
  0x2a   :  { %v445_v60 = vmul.u32 %v443_v53, %v441_v11  ;;  %v446_v61 = vmul.u32 %v444_v54, %v441_v11  ;;  %v447_v62 = vmul.u32 %v443_v53, %v913_v15  ;;  %v448_v0 = vmul.u32 %v444_v54, %v913_v15 }
  0x2b   :  { %v467_v3 = vmul.u32 %v465_v56, %v441_v11  ;;  %v120_v5 = vshll.u32 %v116_v47, 16  ;;  %v468_v13 = vmul.u32 %v466_v57, %v441_v11  ;;  %v105_v14 = vsel %vm104_vm11, 1, %v838_v41 }
  0x2c   :  { %v449_v8 = vshll.u32 %v446_v61, 16  ;;  %v451_v10 = vshll.u32 %v447_v62, 16  ;;  %v469_v16 = vmul.u32 %v465_v56, %v913_v15  ;;  %v107_v17 = vadd.s32 %v105_v14, %v103_v55 }
  0x2d   :  { %vm122_vm12 = vc.u32 %v114_v44, %v118_v59  ;;  %v124_v23 = vadd.s32 %v118_v59, %v114_v44  ;;  %v470_v21 = vmul.u32 %v466_v57, %v913_v15  ;;  %v121_v11 = vshrl.u32 %v116_v47, 16 }
  0x2e   :  { %vm453_vm13 = vc.u32 %v445_v60, %v449_v8  ;;  %v455_v25 = vadd.s32 %v449_v8, %v445_v60  ;;  %v123_v26 = vsel %vm122_vm12, 1, %v838_v41  ;;  %v108_v28 = vadd.s32 %v107_v17, %v97_v58 }
  0x2f   :  { %v454_v27 = vsel %vm453_vm13, 1, %v838_v41  ;;  %v125_v32 = vadd.s32 %v123_v26, %v117_v48  ;;  %vm126_vm14 = vc.u32 %v124_v23, %v120_v5  ;;  %v450_v29 = vshrl.u32 %v446_v61, 16 }
  0x30   :  { %v456_v33 = vadd.s32 %v454_v27, %v448_v0  ;;  %v127_v35 = vsel %vm126_vm14, 1, %v838_v41  ;;  %vm457_vm15 = vc.u32 %v455_v25, %v451_v10  ;;  %v471_v34 = vshll.u32 %v468_v13, 16 }
  0x31   :  { %v129_v36 = vadd.s32 %v127_v35, %v125_v32  ;;  %v458_v31 = vsel %vm457_vm15, 1, %v838_v41  ;;  %v109_v37 = vadd.s32 %v108_v28, %v99_v63  ;;  %v128_v38 = vadd.s32 %v124_v23, %v120_v5 }
  0x32   :  { %v460_v15 = vadd.s32 %v458_v31, %v456_v33  ;;  %v473_v39 = vshll.u32 %v469_v16, 16  ;;  %v78_v40 = vsel %vm72_vm5, %v908_v12, %v931_v30  ;;  %v408_v42 = vshrl.u32 %v832_v22, %v875_v49 }
  0x33   :  { %v130_v44 = vadd.s32 %v129_v36, %v119_v4  ;;  %vm475_vm0 = vc.u32 %v467_v3, %v471_v34  ;;  %v429_v45 = vsel %vm427_vm9, %v924_v24, 2102212464  ;;  %v477_v47 = vadd.s32 %v471_v34, %v467_v3 }
  0x34   :  { %v476_v46 = vsel %vm475_vm0, 1, %v838_v41  ;;  %v452_v50 = vshrl.u32 %v447_v62, 16  ;;  %v461_v52 = vadd.s32 %v460_v15, %v450_v29  ;;  %v132_v54 = vmul.u32 %v871_v43, %v78_v40 }
  0x35   :  { %v131_v48 = vadd.s32 %v130_v44, %v121_v11  ;;  %v478_v53 = vadd.s32 %v476_v46, %v470_v21  ;;  %vm134_vm1 = vc.u32 %v109_v37, %v128_v38  ;;  %v472_v20 = vshrl.u32 %v468_v13, 16 }
  0x36   :  { %vm479_vm2 = vc.u32 %v477_v47, %v473_v39  ;;  %v428_v22 = vsel %vm424_vm6, %v408_v42, %v917_v18  ;;  %v430_v49 = vsel %vm426_vm8, %v919_v19, %v429_v45  ;;  %v474_v30 = vshrl.u32 %v469_v16, 16 }
  0x37   :  { %v135_v12 = vadd.s32 1, %v131_v48  ;;  %v480_v24 = vsel %vm479_vm2, 1, %v838_v41  ;;  %v462_v55 = vadd.s32 %v461_v52, %v452_v50  ;;  %v481_v58 = vadd.s32 %v477_v47, %v473_v39 }
  0x38   :  { %v482_v56 = vadd.s32 %v480_v24, %v478_v53  ;;  %v431_v43 = vsel %vm425_vm10, %v428_v22, %v430_v49  ;;  %v133_v23 = vadd.s32 %v128_v38, %v109_v37  ;;  %vm41_vm8 = vcmp.lt.s32.totalorder %v855_v1, 0 }
  0x39   :  { %v136_v57 = vsel %vm134_vm1, %v135_v12, %v131_v48  ;;  %v485_v18 = vmul.u32 %v880_v51, %v431_v43  ;;  %vm487_vm3 = vc.u32 %v462_v55, %v481_v58  ;;  %v486_v31 = vadd.s32 %v481_v58, %v462_v55 }
  0x3a   :  { %v137_v59 = vadd.s32 %v136_v57, %v132_v54  ;;  %v483_v60 = vadd.s32 %v482_v56, %v472_v20  ;;  %vm40_vm9 = vcmp.le.f32.partialorder %v39_v6, 0.7853982  ;;  %vm394_vm10 = vcmp.lt.s32.totalorder %v857_v2, 0 }
  0x3b   :  { %vm393_vm11 = vcmp.le.f32.partialorder %v392_v9, 0.7853982  ;;  %vm182_vm12 = vweird.f32 %v855_v1 }
  0x3c   :  { %v138_v61 = vadd.s32 536870912, %v137_v59  ;;  %v484_v62 = vadd.s32 %v483_v60, %v474_v30 }
  0x3e   :  { %v139_v63 = vshrl.u32 %v138_v61, 30  ;;  %v488_v19 = vadd.s32 1, %v484_v62 }
  0x40   :  { %v140_v0 = vshll.u32 %v139_v63, 30  ;;  %v489_v3 = vsel %vm487_vm3, %v488_v19, %v484_v62  ;;  %v163_v47 = vsub.s32 4, %v139_v63 }
  0x41   :  { %v490_v41 = vadd.s32 %v489_v3, %v485_v18 }
  0x42   :  { %v141_v4 = vsub.s32 %v137_v59, %v140_v0  ;;  %v164_v49 = vsel %vm41_vm8, %v163_v47, %v139_v63 }
  0x43   :  { %v491_v5 = vadd.s32 536870912, %v490_v41  ;;  %v166_v57 = vsel %vm40_vm9, 0, %v164_v49 }
  0x44   :  { %vm142_vm4 = vcmp.lt.s32.totalorder %v141_v4, 0  ;;  %v143_v8 = vsub.s32 0, %v141_v4  ;;  %v183_v62 = vadd.s32 3, %v166_v57 }
  0x45   :  { %v492_v10 = vshrl.u32 %v491_v5, 30 }
  0x46   :  { %v144_v13 = vsel %vm142_vm4, %v143_v8, %v141_v4  ;;  %v184_v8 = vand.u32 3, %v183_v62 }
  0x47   :  { %v145_v7 = vclz %v144_v13  ;;  %v493_v14 = vshll.u32 %v492_v10, 30  ;;  %v516_v53 = vsub.s32 4, %v492_v10 }
  0x48   :  { %vm189_vm13 = vcmp.eq.s32.totalorder %v184_v8, 2  ;;  %vm185_vm15 = vcmp.lt.s32.totalorder %v184_v8, 2  ;;  %vm186_vm0 = vcmp.eq.s32.totalorder %v184_v8, 0 }
  0x49   :  { %v757_v16 = vadd.s32 4294967294, %v145_v7  ;;  %v494_v17 = vsub.s32 %v490_v41, %v493_v14  ;;  %v517_v56 = vsel %vm394_vm10, %v516_v53, %v492_v10  ;;  %v338_v10 = vand.u32 3, %v166_v57 }
  0x4a   :  { %v519_v61 = vsel %vm393_vm11, 0, %v517_v56 }
  0x4b   :  { %vm758_vm5 = vcmp.lt.s32.totalorder %v757_v16, 0  ;;  %vm495_vm6 = vcmp.lt.s32.totalorder %v494_v17, 0  ;;  %v496_v51 = vsub.s32 0, %v494_v17  ;;  %v536_v3 = vadd.s32 3, %v519_v61 }
  0x4c   :  { %v148_v25 = vsel %vm758_vm5, 0, %v757_v16  ;;  %v359_v16 = vlaneseq  ;;  %vm343_vm14 = vcmp.eq.s32.totalorder %v338_v10, 2  ;;  %vm339_vm1 = vcmp.lt.s32.totalorder %v338_v10, 2 }
  0x4d   :  { %v149_v21 = vsub.s32 32, %v148_v25  ;;  %v150_v26 = vshll.u32 %v141_v4, %v148_v25  ;;  %v153_v27 = vsub.s32 4294967266, %v148_v25  ;;  %v497_v28 = vsel %vm495_vm6, %v496_v51, %v494_v17 }
  0x4e   :  { %v498_v32 = vclz %v497_v28  ;;  %vm340_vm2 = vcmp.eq.s32.totalorder %v338_v10, 0  ;;  %vm1010_vm3 = vcmp.lt.s32.totalorder %v359_v16, 512 }
  0x4f   :  { %v151_v33 = vshrl.u32 %v133_v23, %v149_v21  ;;  %v154_v11 = vadd.s32 127, %v153_v27 }
  0x50   :  { %v763_v35 = vadd.s32 4294967294, %v498_v32 }
  0x51   :  { %v152_v36 = vor.u32 %v151_v33, %v150_v26  ;;  %v155_v29 = vshll.u32 %v154_v11, 23  ;;  %v691_v26 = vand.u32 3, %v519_v61 }
  0x52   :  { %vm764_vm7 = vcmp.lt.s32.totalorder %v763_v35, 0 }
  0x53   :  { %v156_v34 = vor.u32 4788187, %v155_v29  ;;  %v159_v15 = vcvt.s32.f32 %v152_v36  ;;  %v501_v39 = vsel %vm764_vm7, 0, %v763_v35  ;;  %vm696_vm7 = vcmp.eq.s32.totalorder %v691_v26, 2 }
  0x54   :  { %v502_v37 = vsub.s32 32, %v501_v39  ;;  %v503_v38 = vshll.u32 %v494_v17, %v501_v39  ;;  %v506_v42 = vsub.s32 4294967266, %v501_v39  ;;  %v1007_v17 = vand.u32 3, %v536_v3 }
  0x55   :  { %v157_v40 = vand.u32 2147483647, %v156_v34 }
  0x56   :  { %v504_v44 = vshrl.u32 %v486_v31, %v502_v37  ;;  %v507_v46 = vadd.s32 127, %v506_v42  ;;  %vm539_vm4 = vcmp.eq.s32.totalorder %v1007_v17, 0  ;;  %vm538_vm5 = vcmp.lt.s32.totalorder %v1007_v17, 2 }
  0x57   :  { %v160_v45 = vmul.f32 %v159_v15, %v157_v40  ;;  %vm542_vm6 = vcmp.eq.s32.totalorder %v1007_v17, 2 }
  0x58   :  { %v505_v48 = vor.u32 %v504_v44, %v503_v38  ;;  %v508_v52 = vshll.u32 %v507_v46, 23 }
  0x59   :  { %v161_v50 = vxor.u32 2147483648, %v160_v45 }
  0x5a   :  { %v509_v20 = vor.u32 4788187, %v508_v52  ;;  %v512_v22 = vcvt.s32.f32 %v505_v48 }
  0x5b   :  { %v162_v54 = vsel %vm41_vm8, %v161_v50, %v160_v45  ;;  %vm352_vm8 = vcmask 1040384  }
  0x5c   :  { %v165_v12 = vsel %vm40_vm9, %v855_v1, %v162_v54  ;;  %v510_v30 = vand.u32 2147483647, %v509_v20  ;;  %vm354_vm9 = vcmask 1042434  }
  0x5d   :  { %v167_v24 = vmul.f32 %v165_v12, %v165_v12 }
  0x5e   :  { %v513_v6 = vmul.f32 %v512_v22, %v510_v30 }
  0x5f   :  { %v168_v55 = vmul.f32 -0.001358992, %v167_v24  ;;  %v175_v58 = vmul.f32 -0.00019511016, %v167_v24 }
  0x60   :  { %v514_v60 = vxor.u32 2147483648, %v513_v6 }
  0x61   :  { %v169_v43 = vadd.f32 0.041655596, %v168_v55  ;;  %v176_v59 = vadd.f32 0.008332121, %v175_v58 }
  0x62   :  { %v515_v19 = vsel %vm394_vm10, %v514_v60, %v513_v6  ;;  %vm356_vm10 = vcmask 1041408  }
  0x63   :  { %v170_v18 = vmul.f32 %v169_v43, %v167_v24  ;;  %v177_v63 = vmul.f32 %v176_v59, %v167_v24  ;;  %v518_v0 = vsel %vm393_vm11, %v857_v2, %v515_v19  ;;  %vm692_vm11 = vcmp.lt.s32.totalorder %v691_v26, 2 }
  0x64   :  { %v520_v5 = vmul.f32 %v518_v0, %v518_v0 }
  0x65   :  { %v171_v41 = vadd.f32 -0.4999988, %v170_v18  ;;  %v178_v4 = vadd.f32 -0.16666654, %v177_v63 }
  0x66   :  { %v521_v7 = vmul.f32 -0.001358992, %v520_v5  ;;  %v528_v14 = vmul.f32 -0.00019511016, %v520_v5 }
  0x67   :  { %v172_v13 = vmul.f32 %v171_v41, %v167_v24  ;;  %v179_v9 = vmul.f32 %v178_v4, %v167_v24 }
  0x68   :  { %v522_v25 = vadd.f32 0.041655596, %v521_v7  ;;  %v529_v21 = vadd.f32 0.008332121, %v528_v14 }
  0x69   :  { %v173_v23 = vadd.f32 1.0, %v172_v13  ;;  %v180_v51 = vadd.f32 1.0, %v179_v9 }
  0x6a   :  { %v523_v32 = vmul.f32 %v522_v25, %v520_v5  ;;  %v530_v33 = vmul.f32 %v529_v21, %v520_v5 }
  0x6b   :  { %v181_v27 = vmul.f32 %v180_v51, %v165_v12  ;;  %v190_v28 = vxor.u32 2147483648, %v173_v23 }
  0x6c   :  { %v524_v31 = vadd.f32 -0.4999988, %v523_v32  ;;  %v531_v34 = vadd.f32 -0.16666654, %v530_v33 }
  0x6d   :  { %v187_v11 = vxor.u32 2147483648, %v181_v27  ;;  %v191_v35 = vsel %vm189_vm13, %v190_v28, %v181_v27  ;;  %v345_v29 = vsel %vm343_vm14, %v190_v28, %v181_v27  ;;  %vm693_vm13 = vcmp.eq.s32.totalorder %v691_v26, 0 }
  0x6e   :  { %v525_v37 = vmul.f32 %v524_v31, %v520_v5  ;;  %v532_v42 = vmul.f32 %v531_v34, %v520_v5 }
  0x6f   :  { %v188_v15 = vsel %vm186_vm0, %v173_v23, %v187_v11  ;;  %v342_v39 = vsel %vm340_vm2, %v173_v23, %v187_v11 }
  0x70   :  { %v192_v38 = vsel %vm185_vm15, %v188_v15, %v191_v35  ;;  %v346_v40 = vsel %vm339_vm1, %v342_v39, %v345_v29  ;;  %v526_v46 = vadd.f32 1.0, %v525_v37  ;;  %v533_v47 = vadd.f32 1.0, %v532_v42 }
  0x71   :  { %v193_v44 = vsel %vm182_vm12, nan, %v192_v38  ;;  %v347_v45 = vsel %vm182_vm12, nan, %v346_v40  ;;  %vm535_vm12 = vweird.f32 %v857_v2 }
  0x72   :  { %377 = vst [vmem:[#allocation1] sm:$0xff] %v193_v44  ;;  %v349_v48 = vrot.slane %v193_v44, 1  ;;  %v350_v50 = vrot.slane %v193_v44, 2  ;;  %v351_v52 = vrot.slane %v193_v44, 3  ;;  %v543_v53 = vxor.u32 2147483648, %v526_v46 }
  0x73   :  { %v367_v54 = vrot.slane %v347_v45, 1  ;;  %v368_v20 = vrot.slane %v347_v45, 2  ;;  %v369_v22 = vrot.slane %v347_v45, 3  ;;  %v534_v49 = vmul.f32 %v533_v47, %v518_v0 }
  0x74   :  { %v353_v12 = vsel %vm352_vm8, %v193_v44, %v349_v48  ;;  %v355_v24 = vsel %vm354_vm9, %v350_v50, %v351_v52 }
  0x75   :  { %v357_v1 = vsel %vm356_vm10, %v353_v12, %v355_v24  ;;  %v370_v30 = vsel %vm352_vm8, %v347_v45, %v367_v54  ;;  %v371_v56 = vsel %vm354_vm9, %v368_v20, %v369_v22  ;;  %v540_v57 = vxor.u32 2147483648, %v534_v49 }
  0x76   :  { %v544_v55 = vsel %vm542_vm6, %v543_v53, %v534_v49  ;;  %v698_v58 = vsel %vm696_vm7, %v543_v53, %v534_v49  ;;  %364 = vst.msk [vmem:[#allocation5 + $0x2] ss:$8 sm:$0xf] %vm1010_vm3, %v357_v1  ;;  %v372_v6 = vsel %vm356_vm10, %v370_v30, %v371_v56 }
  0x77   :  { %375 = vst.msk [vmem:[#allocation5 + $0x3] ss:$8 sm:$0xf] %vm1010_vm3, %v372_v6  ;;  %v541_v43 = vsel %vm539_vm4, %v526_v46, %v540_v57  ;;  %v695_v59 = vsel %vm693_vm13, %v526_v46, %v540_v57 }
  0x78   :  { %v545_v61 = vsel %vm538_vm5, %v541_v43, %v544_v55  ;;  %v699_v62 = vsel %vm692_vm11, %v695_v59, %v698_v58 }
  0x79   :  { %v379_v60 = vld [vmem:[#allocation1 + $0x1] ss:$2 sm:$0xff]  ;;  %v546_v18 = vsel %vm535_vm12, nan, %v545_v61  ;;  %v700_v63 = vsel %vm535_vm12, nan, %v699_v62 }
  0x7a   :  { %382 = vst.msk [vmem:[#allocation5 + $0x4] ss:$8 sm:$0xf] %vm1010_vm3, %v379_v60  ;;  %v702_v2 = vrot.slane %v546_v18, 1  ;;  %v703_v19 = vrot.slane %v546_v18, 2  ;;  %v704_v0 = vrot.slane %v546_v18, 3 }
  0x7b   :  { %384 = vst [vmem:[#allocation1] sm:$0xff] %v347_v45  ;;  %v713_v3 = vrot.slane %v700_v63, 1  ;;  %v714_v41 = vrot.slane %v700_v63, 2  ;;  %v715_v4 = vrot.slane %v700_v63, 3 }
  0x7c   :  { %v705_v5 = vsel %vm352_vm8, %v546_v18, %v702_v2  ;;  %v706_v8 = vsel %vm354_vm9, %v703_v19, %v704_v0 }
  0x7d   :  { %v716_v10 = vsel %vm352_vm8, %v700_v63, %v713_v3  ;;  %v707_v13 = vsel %vm356_vm10, %v705_v5, %v706_v8  ;;  %v717_v9 = vsel %vm354_vm9, %v714_v41, %v715_v4 }
  0x7e   :  { %710 = vst.msk [vmem:[#allocation5 + $0x6] ss:$8 sm:$0xf] %vm1010_vm3, %v707_v13  ;;  %v718_v7 = vsel %vm356_vm10, %v716_v10, %v717_v9 }
  0x7f   :  { %721 = vst.msk [vmem:[#allocation5 + $0x7] ss:$8 sm:$0xf] %vm1010_vm3, %v718_v7 }
  0x82   :  { %v386_v14 = vld [vmem:[#allocation1 + $0x1] ss:$2 sm:$0xff] }
  0x83   :  { %389 = vst.msk [vmem:[#allocation5 + $0x5] ss:$8 sm:$0xf] %vm1010_vm3, %v386_v14 }
  0x84   :  { %723 = vst [vmem:[#allocation1] sm:$0xff] %v546_v18 }
  0x8b   :  { %v725_v16 = vld [vmem:[#allocation1 + $0x1] ss:$2 sm:$0xff] }
  0x8c   :  { %728 = vst.msk [vmem:[#allocation5 + $0x20] ss:$8 sm:$0xf] %vm1010_vm3, %v725_v16 }
  0x8d   :  { %730 = vst [vmem:[#allocation1] sm:$0xff] %v700_v63 }
  0x94   :  { %v732_v17 = vld [vmem:[#allocation1 + $0x1] ss:$2 sm:$0xff] }
  0x95   :  { %735 = vst.msk [vmem:[#allocation5 + $0x21] ss:$8 sm:$0xf] %vm1010_vm3, %v732_v17 }
  0x96   :  { %749 = dma.vmem_to_hbm [thread:$0]  %s742_s11, 1024, %s744_s14, [#allocation4], %s840_s15, %s840_s15, %s841_s16  }
  0x97   :  { %829 = dma.done.wait [#allocation4], 1024  }
  0x98   :  { %830 = vsyncadd [#allocation4], 4294966272 }
  0x99   :  { %754 = vsyncpa [#allocation3], 1 }
  0x9a   :  { %755 = vsyncpa [#allocation4], 1 }

</bundles_post_ra>
